<compile_context>
chip_gen: v7x
topology: tpu7x:2x2x1
jax: 0.10.0
libtpu: 0.0.40
codegen_flags: <defaults>
</compile_context>

<pallas_src>
import functools

import jax
import jax.numpy as jnp
import numpy as np
from jax import lax
from jax.experimental import pallas as pl
from jax.experimental.pallas import tpu as pltpu

NEG_SLOPE = 0.01   # F.leaky_relu default
_LANE = 128


def _round_up(x, m):
    return (x + m - 1) // m * m


def _causal_conv_kernel(x_ref, halo_ref, w_ref, b_ref, o_ref, *,
                        K, dilation, pad, C_in, use_mxu, fold_im2col, compute_dtype):
    # x_ref:    (1, C_in, TL)              current time tile of x
    # halo_ref: (1, 1, C_in, max(pad, 1))  last `pad` samples of the previous tile (zeros for t==0)
    # w_ref:    (TCo, K*C_in)              taps folded into the contraction dim
    # b_ref:    (TCo, 1)                   f32
    # o_ref:    (1, TCo, TL)
    cdt = compute_dtype if use_mxu else jnp.float32
    cur = x_ref[0].astype(cdt)                                   # cast ONCE, right after load
    tl = cur.shape[-1]
    if pad > 0:
        halo = halo_ref[0, 0].astype(cdt)                        # (C_in, pad)
        xh = jnp.concatenate([halo, cur], axis=-1)               # (C_in, TL + pad)
    else:
        xh = cur

    if use_mxu:
        w = w_ref[...].astype(cdt)
        if K == 1:
            acc = jnp.dot(w, xh, preferred_element_type=jnp.float32)
        elif fold_im2col:
            # im2col over the K taps -> one folded, lane-aligned MXU matmul.
            xcat = jnp.concatenate(
                [xh[:, k * dilation:k * dilation + tl] for k in range(K)], axis=0)
            acc = jnp.dot(w, xcat, preferred_element_type=jnp.float32)
        else:
            # Large K*C_in: skip the K-fold im2col copy, accumulate K dots (f32 accumulator).
            acc = jnp.dot(w[:, 0:C_in], xh[:, 0:tl], preferred_element_type=jnp.float32)
            for k in range(1, K):
                acc = acc + jnp.dot(w[:, k * C_in:(k + 1) * C_in],
                                    xh[:, k * dilation:k * dilation + tl],
                                    preferred_element_type=jnp.float32)
    else:
        # Tiny-channel VPU path: per-tap broadcast FMA, no im2col, no MXU (f32 throughout).
        w = w_ref[...].astype(jnp.float32)                       # (TCo, K*C_in), tiny
        acc = jnp.zeros((w.shape[0], tl), jnp.float32)
        for k in range(K):
            win = xh[:, k * dilation:k * dilation + tl]          # (C_in, TL), one shift per tap
            for c in range(C_in):
                acc = acc + w[:, k * C_in + c:k * C_in + c + 1] * win[c:c + 1, :]

    acc = acc + b_ref[...]                                       # f32 bias
    y = jnp.where(acc >= 0, acc, NEG_SLOPE * acc)                # leaky_relu on the VPU, f32
    o_ref[0] = y.astype(o_ref.dtype)


def causal_conv1d_embedding(x, weight, bias, *, dilation=1, time_tile=None,
                            compute_dtype=jnp.bfloat16, force_path=None, fold_im2col=None):
    """Pallas TPU forward of CausalConv1dEmbedding.

    x: (B, C_in, L); weight: (C_out, C_in, K); bias: (C_out,).  Returns (B, C_out, L).
    """
    B, C_in, L = x.shape
    C_out, C_in_w, K = weight.shape
    assert C_in_w == C_in, (C_in_w, C_in)
    pad = (K - 1) * dilation
    hw = max(pad, 1)

    # ---- static path selection -------------------------------------------------------------
    if force_path is None:
        use_mxu = not (C_out <= 16 and K * C_in <= 32)
    else:
        use_mxu = (force_path == "mxu")
    if fold_im2col is None:
        fold_im2col = (K * C_in <= 512)

    # C_out tiling so large C_out does not shrink the time tile (TCo == C_out for small models).
    TCo = C_out if C_out <= 256 else 256
    nCo = -(-C_out // TCo)

    w_dtype = compute_dtype if use_mxu else jnp.float32
    cbytes = jnp.dtype(compute_dtype).itemsize if use_mxu else 4
    w_bytes = jnp.dtype(w_dtype).itemsize
    in_it = jnp.dtype(x.dtype).itemsize
    out_it = in_it                                   # output keeps x.dtype

    # ---- chip-aware VMEM budgets -------------------------------------------------------------
    try:
        vmem_cap = int(pltpu.get_tpu_info().vmem_capacity_bytes)
    except Exception:
        vmem_cap = 64 * 2**20                        # conservative (v7x-sized) fallback
    budget = max(8 * 2**20, vmem_cap // 4)           # per-step live-set budget for tile selection
    limit_cap = max(32 * 2**20, (vmem_cap * 3) // 4)  # ~48 MiB on v7x, ~96 MiB on v5e/v6e

    def live_bytes(tl):
        """Honest per-grid-step VMEM estimate: double-buffered blocks + in-kernel temporaries."""
        blocks = 2 * (C_in * tl * in_it              # x tile
                      + C_in * hw * in_it            # halo tile
                      + TCo * tl * out_it            # out tile
                      + TCo * K * C_in * w_bytes     # weight block (pipeline-resident)
                      + TCo * 4)                     # bias block
        tmp = C_in * (tl + pad) * cbytes             # xh concat copy
        if use_mxu and fold_im2col and K > 1:
            tmp += K * C_in * tl * cbytes            # im2col buffer
        tmp += TCo * tl * 4                          # f32 accumulator
        tmp += TCo * tl * out_it                     # cast before store
        return blocks + tmp

    # ---- time-tile selection -------------------------------------------------------------------
    if time_tile is not None:
        TL = min(time_tile, L)
    else:
        TL = _LANE
        for cand in (4096, 2048, 1024, 512, 256, 128):
            if live_bytes(cand) <= budget:
                TL = cand
                break
        TL = max(TL, _round_up(pad, _LANE))          # causal halo must be narrower than a tile
        if TL >= L:
            TL = L
        # Keep both v7x TensorCores busy for single-batch medium sequences (cheap on 1-TC chips).
        if TL == L and B * nCo == 1 and L >= 512:
            half = _round_up(-(-L // 2), _LANE)
            if pad <= half < L:
                TL = half
    if TL < L:
        assert TL % _LANE == 0, "time_tile must be a multiple of 128 when it tiles L"
        assert TL >= pad, "time_tile must be >= (kernel_size - 1) * dilation"
    else:
        TL = L
    nT = -(-L // TL)

    # ---- per-tile causal halo (tiny side array; x itself is DMA'd from HBM exactly once) -------
    #   halo[b, t] = x[b, :, t*TL - pad : t*TL] for t > 0, zeros for t == 0.
    if pad > 0 and nT > 1:
        tails = [x[:, :, t * TL - pad:t * TL] for t in range(1, nT)]
        halo = jnp.stack([jnp.zeros((B, C_in, pad), x.dtype)] + tails, axis=1)
    else:
        halo = jnp.zeros((B, nT, C_in, hw), x.dtype)

    # Fold the K taps into the contraction dim: W2[co, k*C_in + c] = weight[co, c, k].
    w2 = jnp.transpose(weight, (0, 2, 1)).reshape(C_out, K * C_in).astype(w_dtype)
    b2 = bias.reshape(C_out, 1).astype(jnp.float32)

    need = live_bytes(TL)
    vmem_limit = int(min(limit_cap, max(32 * 2**20, 4 * need)))
    vmem_limit = max(vmem_limit, int(need + 4 * 2**20))   # never starve the chosen tile

    kernel = functools.partial(_causal_conv_kernel, K=K, dilation=dilation, pad=pad,
                               C_in=C_in, use_mxu=use_mxu, fold_im2col=fold_im2col,
                               compute_dtype=compute_dtype)

    # NOTE: w2/b2 are pipeline-resident (constant index_map).  Single-buffering them via
    # pl.Buffered(1) was considered, but their footprint is negligible next to the time tiles,
    # so the default buffering is kept for lowering robustness.
    return pl.pallas_call(
        kernel,
        out_shape=jax.ShapeDtypeStruct((B, C_out, L), x.dtype),
        grid_spec=pltpu.PrefetchScalarGridSpec(
            num_scalar_prefetch=0,
            grid=(B, nCo, nT),
            in_specs=[
                pl.BlockSpec((1, C_in, TL), lambda b, j, t: (b, 0, t)),
                pl.BlockSpec((1, 1, C_in, hw), lambda b, j, t: (b, t, 0, 0)),
                pl.BlockSpec((TCo, K * C_in), lambda b, j, t: (j, 0)),
                pl.BlockSpec((TCo, 1), lambda b, j, t: (j, 0)),
            ],
            out_specs=pl.BlockSpec((1, TCo, TL), lambda b, j, t: (b, j, t)),
        ),
        compiler_params=pltpu.CompilerParams(
            dimension_semantics=("parallel", "parallel", "parallel"),
            vmem_limit_bytes=vmem_limit),
    )(x, halo, w2, b2)


def _reference(x, weight, bias, *, dilation, operand_dtype=jnp.float32):
    """Pure-JAX reference: F.leaky_relu(conv1d(F.pad(x, (pad, 0)))), with operand rounding
    matching the kernel path (bf16 on the MXU paths, f32 on the VPU path)."""
    K = weight.shape[-1]
    pad = (K - 1) * dilation
    xr = x.astype(operand_dtype).astype(jnp.float32)
    wr = weight.astype(operand_dtype).astype(jnp.float32)
    y = lax.conv_general_dilated(
        xr, wr,
        window_strides=(1,),
        padding=[(pad, 0)],
        rhs_dilation=(dilation,),
        dimension_numbers=("NCH", "OIH", "NCH"),
        precision=lax.Precision.HIGHEST,
    ) + bias[None, :, None]
    return jnp.where(y >= 0, y, NEG_SLOPE * y).astype(x.dtype)


if __name__ == "__main__":
    key = jax.random.PRNGKey(0)

    def run_case(B, C_in, C_out, L, K, dilation, time_tile=None, force_path=None,
                 fold_im2col=None):
        kx, kw, kb = jax.random.split(jax.random.fold_in(key, B * 131 + C_in * 17 + L), 3)
        x = jax.random.normal(kx, (B, C_in, L), dtype=jnp.float32)
        bound = 1.0 / np.sqrt(C_in * K)             # nn.Conv1d default init range
        weight = jax.random.uniform(kw, (C_out, C_in, K), jnp.float32, -bound, bound)
        bias = jax.random.uniform(kb, (C_out,), jnp.float32, -bound, bound)

        out = jax.block_until_ready(causal_conv1d_embedding(
            x, weight, bias, dilation=dilation, time_tile=time_tile,
            force_path=force_path, fold_im2col=fold_im2col))
        if force_path is None:
            use_mxu = not (C_out <= 16 and K * C_in <= 32)
        else:
            use_mxu = (force_path == "mxu")
        op_dt = jnp.bfloat16 if use_mxu else jnp.float32
        ref = jax.block_until_ready(_reference(x, weight, bias, dilation=dilation,
                                               operand_dtype=op_dt))
        np.testing.assert_allclose(np.asarray(out), np.asarray(ref), rtol=1e-3, atol=1e-3)

    # Module-sized demo shape (batch=2, in=4, out=8, L=16, K=3, dilation=2) -> tiny-channel VPU path.
    run_case(B=2, C_in=4, C_out=8, L=16, K=3, dilation=2)
    # Multi time-tile + causal halo logic on the VPU path.
    run_case(B=2, C_in=4, C_out=8, L=1536, K=3, dilation=2, time_tile=512)
    # MXU path (folded im2col); single-batch medium sequence exercises the auto time-split.
    run_case(B=1, C_in=16, C_out=32, L=640, K=3, dilation=2, force_path="mxu")
    # MXU path with per-tap accumulated dots (no im2col) -- the large-C_in regime.
    run_case(B=1, C_in=16, C_out=32, L=640, K=3, dilation=2, force_path="mxu", fold_im2col=False)

    print("KERNEL_OK")
</pallas_src>

<mosaic_0001>
module attributes {stable_mosaic.version = 11 : i64} {
  func.func @_causal_conv_kernel(%arg0: i32, %arg1: i32, %arg2: i32, %arg3: memref<1x4x16xf32, #tpu.memory_space<vmem>>, %arg4: memref<1x1x4x4xf32, #tpu.memory_space<vmem>>, %arg5: memref<8x12xf32, #tpu.memory_space<vmem>>, %arg6: memref<8x1xf32, #tpu.memory_space<vmem>>, %arg7: memref<1x8x16xf32, #tpu.memory_space<vmem>>) attributes {dimension_semantics = [#tpu.dimension_semantics<parallel>, #tpu.dimension_semantics<parallel>, #tpu.dimension_semantics<parallel>], iteration_bounds = array<i64: 2, 1, 1>, scalar_prefetch = 0 : i64, scratch_operands = 0 : i64, tpu.core_type = #tpu.core_type<tc>, window_params = [{transform_indices = @transform_0, window_bounds = array<i64: 1, 4, 16>}, {transform_indices = @transform_1, window_bounds = array<i64: 1, 1, 4, 4>}, {transform_indices = @transform_2, window_bounds = array<i64: 8, 12>}, {transform_indices = @transform_3, window_bounds = array<i64: 8, 1>}, {transform_indices = @transform_4, window_bounds = array<i64: 1, 8, 16>}]} {
    %c0 = arith.constant 0 : index
    %c0_0 = arith.constant 0 : index
    %c0_1 = arith.constant 0 : index
    %0 = vector.load %arg3[%c0, %c0_0, %c0_1] : memref<1x4x16xf32, #tpu.memory_space<vmem>>, vector<1x4x16xf32>
    %1 = vector.shape_cast %0 : vector<1x4x16xf32> to vector<4x16xf32>
    %c0_2 = arith.constant 0 : index
    %c0_3 = arith.constant 0 : index
    %c0_4 = arith.constant 0 : index
    %c0_5 = arith.constant 0 : index
    %2 = vector.load %arg4[%c0_2, %c0_3, %c0_4, %c0_5] : memref<1x1x4x4xf32, #tpu.memory_space<vmem>>, vector<1x1x4x4xf32>
    %3 = vector.shape_cast %2 : vector<1x1x4x4xf32> to vector<4x4xf32>
    %4 = tpu.concatenate %3, %1 in 1 : vector<4x4xf32>, vector<4x16xf32> -> vector<4x20xf32>
    %c0_6 = arith.constant 0 : index
    %c0_7 = arith.constant 0 : index
    %5 = vector.load %arg5[%c0_6, %c0_7] : memref<8x12xf32, #tpu.memory_space<vmem>>, vector<8x12xf32>
    %cst = arith.constant 0.000000e+00 : f32
    %6 = vector.broadcast %cst : f32 to vector<8x16xf32>
    %7 = vector.extract_strided_slice %4 {offsets = [0, 0], sizes = [4, 16], strides = [1, 1]} : vector<4x20xf32> to vector<4x16xf32>
    %8 = vector.extract_strided_slice %5 {offsets = [0, 0], sizes = [8, 1], strides = [1, 1]} : vector<8x12xf32> to vector<8x1xf32>
    %9 = vector.extract_strided_slice %7 {offsets = [0, 0], sizes = [1, 16], strides = [1, 1]} : vector<4x16xf32> to vector<1x16xf32>
    %10 = vector.broadcast %8 : vector<8x1xf32> to vector<8x16xf32>
    %11 = vector.broadcast %9 : vector<1x16xf32> to vector<8x16xf32>
    %12 = arith.mulf %10, %11 : vector<8x16xf32>
    %13 = arith.addf %6, %12 : vector<8x16xf32>
    %14 = vector.extract_strided_slice %5 {offsets = [0, 1], sizes = [8, 1], strides = [1, 1]} : vector<8x12xf32> to vector<8x1xf32>
    %15 = vector.extract_strided_slice %7 {offsets = [1, 0], sizes = [1, 16], strides = [1, 1]} : vector<4x16xf32> to vector<1x16xf32>
    %16 = vector.broadcast %14 : vector<8x1xf32> to vector<8x16xf32>
    %17 = vector.broadcast %15 : vector<1x16xf32> to vector<8x16xf32>
    %18 = arith.mulf %16, %17 : vector<8x16xf32>
    %19 = arith.addf %13, %18 : vector<8x16xf32>
    %20 = vector.extract_strided_slice %5 {offsets = [0, 2], sizes = [8, 1], strides = [1, 1]} : vector<8x12xf32> to vector<8x1xf32>
    %21 = vector.extract_strided_slice %7 {offsets = [2, 0], sizes = [1, 16], strides = [1, 1]} : vector<4x16xf32> to vector<1x16xf32>
    %22 = vector.broadcast %20 : vector<8x1xf32> to vector<8x16xf32>
    %23 = vector.broadcast %21 : vector<1x16xf32> to vector<8x16xf32>
    %24 = arith.mulf %22, %23 : vector<8x16xf32>
    %25 = arith.addf %19, %24 : vector<8x16xf32>
    %26 = vector.extract_strided_slice %5 {offsets = [0, 3], sizes = [8, 1], strides = [1, 1]} : vector<8x12xf32> to vector<8x1xf32>
    %27 = vector.extract_strided_slice %7 {offsets = [3, 0], sizes = [1, 16], strides = [1, 1]} : vector<4x16xf32> to vector<1x16xf32>
    %28 = vector.broadcast %26 : vector<8x1xf32> to vector<8x16xf32>
    %29 = vector.broadcast %27 : vector<1x16xf32> to vector<8x16xf32>
    %30 = arith.mulf %28, %29 : vector<8x16xf32>
    %31 = arith.addf %25, %30 : vector<8x16xf32>
    %32 = vector.extract_strided_slice %4 {offsets = [0, 2], sizes = [4, 16], strides = [1, 1]} : vector<4x20xf32> to vector<4x16xf32>
    %33 = vector.extract_strided_slice %5 {offsets = [0, 4], sizes = [8, 1], strides = [1, 1]} : vector<8x12xf32> to vector<8x1xf32>
    %34 = vector.extract_strided_slice %32 {offsets = [0, 0], sizes = [1, 16], strides = [1, 1]} : vector<4x16xf32> to vector<1x16xf32>
    %35 = vector.broadcast %33 : vector<8x1xf32> to vector<8x16xf32>
    %36 = vector.broadcast %34 : vector<1x16xf32> to vector<8x16xf32>
    %37 = arith.mulf %35, %36 : vector<8x16xf32>
    %38 = arith.addf %31, %37 : vector<8x16xf32>
    %39 = vector.extract_strided_slice %5 {offsets = [0, 5], sizes = [8, 1], strides = [1, 1]} : vector<8x12xf32> to vector<8x1xf32>
    %40 = vector.extract_strided_slice %32 {offsets = [1, 0], sizes = [1, 16], strides = [1, 1]} : vector<4x16xf32> to vector<1x16xf32>
    %41 = vector.broadcast %39 : vector<8x1xf32> to vector<8x16xf32>
    %42 = vector.broadcast %40 : vector<1x16xf32> to vector<8x16xf32>
    %43 = arith.mulf %41, %42 : vector<8x16xf32>
    %44 = arith.addf %38, %43 : vector<8x16xf32>
    %45 = vector.extract_strided_slice %5 {offsets = [0, 6], sizes = [8, 1], strides = [1, 1]} : vector<8x12xf32> to vector<8x1xf32>
    %46 = vector.extract_strided_slice %32 {offsets = [2, 0], sizes = [1, 16], strides = [1, 1]} : vector<4x16xf32> to vector<1x16xf32>
    %47 = vector.broadcast %45 : vector<8x1xf32> to vector<8x16xf32>
    %48 = vector.broadcast %46 : vector<1x16xf32> to vector<8x16xf32>
    %49 = arith.mulf %47, %48 : vector<8x16xf32>
    %50 = arith.addf %44, %49 : vector<8x16xf32>
    %51 = vector.extract_strided_slice %5 {offsets = [0, 7], sizes = [8, 1], strides = [1, 1]} : vector<8x12xf32> to vector<8x1xf32>
    %52 = vector.extract_strided_slice %32 {offsets = [3, 0], sizes = [1, 16], strides = [1, 1]} : vector<4x16xf32> to vector<1x16xf32>
    %53 = vector.broadcast %51 : vector<8x1xf32> to vector<8x16xf32>
    %54 = vector.broadcast %52 : vector<1x16xf32> to vector<8x16xf32>
    %55 = arith.mulf %53, %54 : vector<8x16xf32>
    %56 = arith.addf %50, %55 : vector<8x16xf32>
    %57 = vector.extract_strided_slice %4 {offsets = [0, 4], sizes = [4, 16], strides = [1, 1]} : vector<4x20xf32> to vector<4x16xf32>
    %58 = vector.extract_strided_slice %5 {offsets = [0, 8], sizes = [8, 1], strides = [1, 1]} : vector<8x12xf32> to vector<8x1xf32>
    %59 = vector.extract_strided_slice %57 {offsets = [0, 0], sizes = [1, 16], strides = [1, 1]} : vector<4x16xf32> to vector<1x16xf32>
    %60 = vector.broadcast %58 : vector<8x1xf32> to vector<8x16xf32>
    %61 = vector.broadcast %59 : vector<1x16xf32> to vector<8x16xf32>
    %62 = arith.mulf %60, %61 : vector<8x16xf32>
    %63 = arith.addf %56, %62 : vector<8x16xf32>
    %64 = vector.extract_strided_slice %5 {offsets = [0, 9], sizes = [8, 1], strides = [1, 1]} : vector<8x12xf32> to vector<8x1xf32>
    %65 = vector.extract_strided_slice %57 {offsets = [1, 0], sizes = [1, 16], strides = [1, 1]} : vector<4x16xf32> to vector<1x16xf32>
    %66 = vector.broadcast %64 : vector<8x1xf32> to vector<8x16xf32>
    %67 = vector.broadcast %65 : vector<1x16xf32> to vector<8x16xf32>
    %68 = arith.mulf %66, %67 : vector<8x16xf32>
    %69 = arith.addf %63, %68 : vector<8x16xf32>
    %70 = vector.extract_strided_slice %5 {offsets = [0, 10], sizes = [8, 1], strides = [1, 1]} : vector<8x12xf32> to vector<8x1xf32>
    %71 = vector.extract_strided_slice %57 {offsets = [2, 0], sizes = [1, 16], strides = [1, 1]} : vector<4x16xf32> to vector<1x16xf32>
    %72 = vector.broadcast %70 : vector<8x1xf32> to vector<8x16xf32>
    %73 = vector.broadcast %71 : vector<1x16xf32> to vector<8x16xf32>
    %74 = arith.mulf %72, %73 : vector<8x16xf32>
    %75 = arith.addf %69, %74 : vector<8x16xf32>
    %76 = vector.extract_strided_slice %5 {offsets = [0, 11], sizes = [8, 1], strides = [1, 1]} : vector<8x12xf32> to vector<8x1xf32>
    %77 = vector.extract_strided_slice %57 {offsets = [3, 0], sizes = [1, 16], strides = [1, 1]} : vector<4x16xf32> to vector<1x16xf32>
    %78 = vector.broadcast %76 : vector<8x1xf32> to vector<8x16xf32>
    %79 = vector.broadcast %77 : vector<1x16xf32> to vector<8x16xf32>
    %80 = arith.mulf %78, %79 : vector<8x16xf32>
    %81 = arith.addf %75, %80 : vector<8x16xf32>
    %c0_8 = arith.constant 0 : index
    %c0_9 = arith.constant 0 : index
    %82 = vector.load %arg6[%c0_8, %c0_9] : memref<8x1xf32, #tpu.memory_space<vmem>>, vector<8x1xf32>
    %83 = vector.broadcast %82 : vector<8x1xf32> to vector<8x16xf32>
    %84 = arith.addf %81, %83 : vector<8x16xf32>
    %cst_10 = arith.constant 0.000000e+00 : f32
    %85 = vector.broadcast %cst_10 : f32 to vector<8x16xf32>
    %86 = arith.cmpf oge, %84, %85 : vector<8x16xf32>
    %cst_11 = arith.constant 0.00999999977 : f32
    %87 = vector.broadcast %cst_11 : f32 to vector<8x16xf32>
    %88 = arith.mulf %87, %84 : vector<8x16xf32>
    %89 = arith.select %86, %84, %88 : vector<8x16xi1>, vector<8x16xf32>
    %c0_12 = arith.constant 0 : index
    %c0_13 = arith.constant 0 : index
    %c0_14 = arith.constant 0 : index
    %90 = vector.load %arg7[%c0_12, %c0_13, %c0_14] : memref<1x8x16xf32, #tpu.memory_space<vmem>>, vector<1x8x16xf32>
    %91 = vector.shape_cast %90 : vector<1x8x16xf32> to vector<8x16xf32>
    %92 = vector.shape_cast %89 : vector<8x16xf32> to vector<1x8x16xf32>
    tpu.vector_store %arg7[%c0_12, %c0_13, %c0_14], %92 {strides = array<i32>} : memref<1x8x16xf32, #tpu.memory_space<vmem>>, vector<1x8x16xf32>,
    return
  }
  func.func @transform_0(%arg0: i32, %arg1: i32, %arg2: i32) -> (i32, i32, i32) {
    %c0_i32 = arith.constant 0 : i32
    %c0_i32_0 = arith.constant 0 : i32
    return %arg0, %c0_i32, %arg2 : i32, i32, i32
  }
  func.func @transform_1(%arg0: i32, %arg1: i32, %arg2: i32) -> (i32, i32, i32, i32) {
    %c0_i32 = arith.constant 0 : i32
    %c0_i32_0 = arith.constant 0 : i32
    %c0_i32_1 = arith.constant 0 : i32
    return %arg0, %arg2, %c0_i32, %c0_i32_0 : i32, i32, i32, i32
  }
  func.func @transform_2(%arg0: i32, %arg1: i32, %arg2: i32) -> (i32, i32) {
    %c0_i32 = arith.constant 0 : i32
    %c0_i32_0 = arith.constant 0 : i32
    return %arg1, %c0_i32 : i32, i32
  }
  func.func @transform_3(%arg0: i32, %arg1: i32, %arg2: i32) -> (i32, i32) {
    %c0_i32 = arith.constant 0 : i32
    %c0_i32_0 = arith.constant 0 : i32
    return %arg1, %c0_i32 : i32, i32
  }
  func.func @transform_4(%arg0: i32, %arg1: i32, %arg2: i32) -> (i32, i32, i32) {
    %c0_i32 = arith.constant 0 : i32
    return %arg0, %arg1, %arg2 : i32, i32, i32
  }
}

</mosaic_0001>

<bundles_post_ra>
// kernel: tpu_custom_call.1
= control target key start
LH: loop header
LB: loop body
LE: loop exit
PB: predicated region body
PF: predicated region fallthrough
CT: control target
= control target key end

     0   :  { %9 = vsyncpa [#allocation3], 0  ;;  %s1037_s0 = inlined_call_operand.vmem [shape: f32[2,4,16], index: 0, kind: input, shape index: {}]   ;;  %s1038_s1 = inlined_call_operand.hbm [shape: f32[2,1,4,4], index: 1, kind: input, shape index: {}]   ;;  %s1039_s2 = inlined_call_operand.vmem [shape: f32[8,12], index: 2, kind: input, shape index: {}]   ;;  %s1040_s3 = inlined_call_operand.vmem [shape: f32[8,1], index: 3, kind: input, shape index: {}]   ;;  %s1041_s4 = inlined_call_operand.hbm [shape: f32[2,8,16], index: 4, kind: output, shape index: {}]  }
   0x1   :  { %11 = vsyncpa [#allocation3 + $0x1], 0 }
   0x2   :  { %12 = vsyncpa [#allocation4], 0 }
   0x3   :  { %14 = vsyncpa [#allocation4 + $0x1], 0  ;;  %s850_s15 = smov 0   ;;  %s852_s16 = smov 0  }
   0x4   :  { %s854_s17 = smov 0   ;;  %s856_s18 = smov 0  }
   0x5   :  { %s858_s19 = smov 0   ;;  %s860_s20 = smov 0  }
   0x6 LB: > { %s588_s21 = sadd.s32 4294967295, %s806_s20   ;;  %s589_s22 = sadd.s32 4294967294, %s806_s20   ;;  %s806_s20 = sphi %s860_s20, %s20_s20   ;;  %s802_s19 = sphi %s858_s19, %s1057_s19   ;;  %s798_s18 = sphi %s856_s18, %s1056_s18   ;;  %s794_s17 = sphi %s854_s17, %s1055_s17   ;;  %s790_s16 = sphi %s852_s16, %s1054_s16   ;;  %s786_s15 = sphi %s850_s15, %s1053_s15  }
   0x7   : > { %s39_s23 = sadd.s32 1, %s802_s19  ;;  %s76_s24 = sadd.s32 1, %s794_s17 }
   0x8   : > { %p41_p0 = scmp.ge.s32.totalorder %s39_s23, 2  ;;  %p83_p1 = scmp.ne.s32.totalorder %s794_s17, %s790_s16 }
   0x9   : > { %p84_p2 = scmp.eq.s32.totalorder %s806_s20, 0  ;;  %p89_p3 = scmp.ne.s32.totalorder %s790_s16, %s786_s15 }
   0xa   : > { %s1059_s23 = smov (%p41_p0, %s39_s23), 0  ;;  %p90_p5 = scmp.eq.s32.totalorder %s588_s21, 0 }
   0xb   : > { %p891_p4 = por %p84_p2, %p83_p1  ;;  %s71_s26 = ssub.s32 %s802_s19, %s1059_s23 }
   0xc   : > { %p169_p6 = scmp.eq.s32.totalorder %s588_s21, 1  ;;  %p74_p7 = scmp.eq.s32.totalorder %s71_s26, 0 }
   0xd   : > { %p897_p8 = por %p90_p5, %p89_p3  ;;  %p175_p10 = scmp.eq.s32.totalorder %s589_s22, 1 }
   0xe   : > { %p901_p9 = por %p169_p6, %p83_p1  ;;  %p616_p13 = scmp.lt.s32.totalorder %s806_s20, 2 }
   0xf   : > { %s906_s29 = scalar_select %p74_p7, %s794_s17, %s76_s24  }
  0x10   : > { %s1045_s28 = scalar_select %p901_p9, 1, 0 }
  0x11   : > { %p908_p11 = por %p175_p10, %p89_p3  ;;  %s219_s5 = sand.u32 1, %s794_s17  }
  0x12   : > { %s594_s6 = sshll.u32 %s219_s5, 2  ;;  %s595_s7 = sshll.u32 %s802_s19, 6 }
  0x13   : > { %s1046_s30 = scalar_select %p908_p11, 1, 0 }
  0x14   : > { %s919_s10 = scalar_lea.hbm %s1038_s1, %s595_s7  ;;  %s223_s11 = scalar_lea.vmem [#allocation2], %s594_s6 }
  0x15   : > { %s231_s12 = sshll.u32 %s223_s11, 4  ;;  %p925_p0 = pnand %p616_p13, %p891_p4  ;;  %s921_s12 = int_to_ptr.vmem [resolvable:$true] %s231_s12 }
  0x16   : > { %s220_s14 = scalar_lea.sflag [#allocation3], %s219_s5  ;;  %s694_s21 = scalar_lea.hbm %s919_s10, 64 }
  0x17   : > { %p695_p3 = scmp.ne.s32.totalorder %s919_s10, %s694_s21  ;;  %p696_p5 = pneg %p925_p0 }
  0x18   : > { %s699_s25 = scalar_lea.hbm %s1038_s1, 128  ;;  %p700_p4 = scmp.lt.u32.totalorder %s919_s10, %s1038_s1 }
  0x19   : > { %p697_p6 = pnand %p696_p5, %p695_p3  ;;  %p701_p10 = scmp.lt.u32.totalorder %s699_s25, %s694_s21 }
  0x1a   : > { %p703_p12 = scmp.lt.u32.totalorder %s694_s21, %s919_s10 }
  0x1b   : > { %p698_p7 = pneg %p697_p6  ;;  %p702_p13 = por %p701_p10, %p700_p4 }
  0x1d   : > { %p704_p1 = por %p703_p12, %p702_p13 }
  0x1f   : > { %p705_p2 = pnand %p704_p1, %p698_p7 }
  0x21   : > { %708 = shalt.err (!%p705_p2)
}
  0x22   : > { %s709_s5 = scalar_lea.vmem %s921_s12, 64  ;;  %s808_s7 = smov [#allocation2]  }
  0x23   : > { %p710_p3 = scmp.ne.s32.totalorder %s921_s12, %s709_s5  ;;  %s714_s8 = sshll.u32 %s808_s7, 4  ;;  %s715_s8 = int_to_ptr.vmem [resolvable:$false] %s714_s8 }
  0x24   : > { %s716_s9 = scalar_lea.vmem %s715_s8, 128  ;;  %p717_p9 = scmp.lt.s32.totalorder %s921_s12, %s715_s8 }
  0x25   : > { %p712_p6 = pnand %p710_p3, %p696_p5  ;;  %p718_p4 = scmp.lt.s32.totalorder %s716_s9, %s709_s5 }
  0x27   : > { %p713_p11 = pneg %p712_p6  ;;  %p719_p10 = por %p718_p4, %p717_p9 }
  0x29   : > { %p720_p12 = pnand %p719_p10, %p713_p11 }
  0x2b   : > { %723 = shalt.err (!%p720_p12)
}
  0x2c   : > { %611 = dma.hbm_to_vmem [thread:$0]  (!%p925_p0), %s919_s10, 64, %s921_s12, %s220_s14  }
  0x2d   : > { %p1048_p1 = scmp.lt.s32.totalorder %s806_s20, 3  ;;  %p1049_p2 = scmp.ge.s32.totalorder %s806_s20, 1 }
  0x2f   : > { %p237_p5 = pnand %p1049_p2, %p1048_p1 }
  0x30   : > { %s961_s11 = sand.u32 (!%p237_p5), 1, %s790_s16  }
  0x31   : > { %240 = sbr.rel (%p237_p5) target bundleno = 360 (0x168), region = 36  ;;  %s597_s21 = sshll.u32 (!%p237_p5), %s961_s11, 2 }
  0x32   : > { %s243_s22 = scalar_lea.sflag (!%p237_p5), [#allocation3], %s961_s11  ;;  %s965_s24 = scalar_lea.vmem (!%p237_p5), [#allocation2], %s597_s21 }
  0x38   : > { %777 = dma.done.wait (%p897_p8), %s243_s22, 64  }
  0x39   : > { %779 = vsyncadd (%p897_p8), %s243_s22, 4294967232  ;;  %p286_p9 = scmp.lt.s32.totalorder %s798_s18, 1  ;;  %v809_v0 = vmov 4   ;;  %v810_v1 = vmov 6   ;;  %v309_v2 = vld [vmem:[%s1039_s2] sm:$0xff]  ;;  %s811_s27 = smov 4   ;;  %v315_v14 = vlaneseq }
  0x3a   : > { %681 = vset.pattern.permute.xlu0 %v809_v0  ;;  %683 = vset.pattern.permute.xlu1 %v810_v1  ;;  %v812_v4 = vmov 5   ;;  %v813_v5 = vmov 7   ;;  %v814_v6 = vmov 8   ;;  %v815_v7 = vmov 9   ;;  %v302_v16 = vld [vmem:[%s965_s24] sm:$0xf] }
  0x3b   : > { %s287_s10 = scalar_select %p286_p9, %s798_s18, 1  ;;  %352 = vperm.xlu0 %681, %v309_v2   ;;  %v816_v8 = vmov 11   ;;  %v817_v9 = vmov 10   ;;  %v818_v10 = vmov 2   ;;  %v819_v11 = vmov 0   ;;  %v431_v37 = vld [vmem:[%s1040_s3] sm:$0xff] }
  0x3c   : > { %v820_v12 = vmov 1   ;;  %v821_v13 = vmov 3   ;;  %v316_v15 = vshrl.u32 %v315_v14, 7  ;;  %vm307_vm0 = vcmask 31744   ;;  %s822_s5 = smov 126   ;;  %s823_s7 = smov 124  }
  0x3d   : > { %s599_s12 = sshll.u32 %s287_s10, 2  ;;  %s598_s21 = sshll.u32 %s961_s11, 3  ;;  %vm441_vm2 = vcmask 130048  }
  0x3e   : > { %s292_s25 = scalar_lea.vmem %s1037_s0, %s599_s12  ;;  %v317_v18 = vsub.s32 0, %v316_v15  ;;  %v337_v21 = vsub.s32 2, %v316_v15  ;;  %v327_v23 = vsub.s32 1, %v316_v15  ;;  %v347_v28 = vsub.s32 3, %v316_v15  ;;  %s601_s22 = sshll.u32 %s798_s18, 7 }
  0x3f   : > { %v301_v3 = vld [vmem:[%s292_s25] sm:$0xf]  ;;  %682 = vset.pattern.permute.xlu0 %v812_v4  ;;  %s285_s24 = scalar_lea.vmem [#allocation5], %s598_s21  ;;  %s988_s14 = scalar_lea.hbm %s1041_s4, %s601_s22 }
  0x40   : > { %304 = vrot.lane.b32.xlu1 %v301_v3, %s811_s27  ;;  %362 = vperm.xlu0 %682, %v309_v2   ;;  %s459_s10 = sshll.u32 %s285_s24, 4  ;;  %s444_s25 = scalar_lea.sflag [#allocation4], %s961_s11  ;;  %s990_s10 = int_to_ptr.vmem [resolvable:$true] %s459_s10 }
  0x41   : > { %s724_s26 = scalar_lea.vmem %s990_s10, 128  ;;  %p1050_p11 = scmp.ne.s32.totalorder %s1045_s28, 0 }
  0x42   : > { %p725_p8 = scmp.ne.s32.totalorder %s990_s10, %s724_s26  ;;  %s824_s18 = smov [#allocation5]  }
  0x43   : > { %s728_s6 = sshll.u32 %s824_s18, 4  ;;  %s729_s6 = int_to_ptr.vmem [resolvable:$false] %s728_s6 }
  0x44   : > { %372 = vperm.xlu1 %683, %v309_v2   ;;  %685 = vset.pattern.permute.xlu0 %v814_v6  ;;  %p726_p0 = pnand %p725_p8, %p1050_p11  ;;  %s730_s27 = scalar_lea.vmem %s729_s6, 256 }
  0x45   : > { %392 = vperm.xlu0 %685, %v309_v2   ;;  %p731_p13 = scmp.lt.s32.totalorder %s990_s10, %s729_s6  ;;  %p732_p3 = scmp.lt.s32.totalorder %s730_s27, %s724_s26 }
  0x46   : > { %p727_p7 = pneg %p726_p0 }
  0x47   : > { %p733_p6 = por %p732_p3, %p731_p13 }
  0x48   : > { %684 = vset.pattern.permute.xlu1 %v813_v5 }
  0x49   : > { %382 = vperm.xlu1 %684, %v309_v2   ;;  %688 = vset.pattern.permute.xlu0 %v816_v8  ;;  %p734_p4 = pnand %p733_p6, %p727_p7 }
  0x4a   : > { %422 = vperm.xlu0 %688, %v309_v2  }
  0x4d   : > { %686 = vset.pattern.permute.xlu1 %v815_v7 }
  0x4e   : > { %402 = vperm.xlu1 %686, %v309_v2   ;;  %691 = vset.pattern.permute.xlu0 %v818_v10 }
  0x4f   : > { %332 = vperm.xlu0 %691, %v309_v2  }
  0x52   : > { %687 = vset.pattern.permute.xlu1 %v817_v9 }
  0x53   : > { %412 = vperm.xlu1 %687, %v309_v2   ;;  %693 = vset.pattern.permute.xlu0 %v819_v11 }
  0x57   : > { %689 = vset.pattern.permute.xlu1 %v819_v11 }
  0x58   : > { %312 = vperm.xlu1 %689, %v309_v2  }
  0x5c   : > { %690 = vset.pattern.permute.xlu1 %v820_v12 }
  0x5d   : > { %322 = vperm.xlu1 %690, %v309_v2  }
  0x61   : > { %692 = vset.pattern.permute.xlu1 %v821_v13 }
  0x62   : > { %342 = vperm.xlu1 %692, %v309_v2  }
  0xb2   : > { %v305_v17 = vpop.permute.xlu1 %304 }
  0xb3   : > { %v308_v19 = vsel %vm307_vm0, %v302_v16, %v305_v17 }
  0xb4   : > { %v318_v20 = vrot.slane %v308_v19, %v317_v18  ;;  %v338_v25 = vrot.slane %v308_v19, %v337_v21  ;;  %v328_v27 = vrot.slane %v308_v19, %v327_v23  ;;  %v348_v32 = vrot.slane %v308_v19, %v347_v28 }
  0xba   : > { %v353_v22 = vpop.permute.xlu0 %352 }
  0xbb   : > { %v355_v24 = vmul.f32 %v353_v22, %v318_v20 }
  0xbd   : > { %357 = vrot.lane.b32.xlu1 %v355_v24, %s822_s5 }
  0xbf   : > { %v363_v30 = vpop.permute.xlu0 %362 }
  0xc0   : > { %v365_v31 = vmul.f32 %v363_v30, %v328_v27 }
  0xc2   : > { %367 = vrot.lane.b32.xlu0 %v365_v31, %s822_s5 }
  0xc3   : > { %v373_v26 = vpop.permute.xlu1 %372 }
  0xc4   : > { %v375_v29 = vmul.f32 %v373_v26, %v338_v25  ;;  %v393_v35 = vpop.permute.xlu0 %392 }
  0xc5   : > { %v395_v36 = vmul.f32 %v393_v35, %v318_v20 }
  0xc6   : > { %377 = vrot.lane.b32.xlu1 %v375_v29, %s822_s5 }
  0xc8   : > { %v383_v33 = vpop.permute.xlu1 %382 }
  0xc9   : > { %v385_v34 = vmul.f32 %v383_v33, %v348_v32  ;;  %v423_v40 = vpop.permute.xlu0 %422 }
  0xca   : > { %397 = vrot.lane.b32.xlu1 %v395_v36, %s823_s7  ;;  %v425_v41 = vmul.f32 %v423_v40, %v348_v32 }
  0xcb   : > { %387 = vrot.lane.b32.xlu0 %v385_v34, %s822_s5 }
  0xcd   : > { %v403_v38 = vpop.permute.xlu1 %402 }
  0xce   : > { %v405_v39 = vmul.f32 %v403_v38, %v328_v27  ;;  %v333_v45 = vpop.permute.xlu0 %332 }
  0xcf   : > { %434 = vperm.xlu0 %693, %v431_v37   ;;  %v339_v49 = vmul.f32 %v338_v25, %v333_v45 }
  0xd0   : > { %407 = vrot.lane.b32.xlu1 %v405_v39, %s823_s7 }
  0xd2   : > { %v413_v42 = vpop.permute.xlu1 %412 }
  0xd3   : > { %v415_v43 = vmul.f32 %v413_v42, %v338_v25  ;;  %427 = vrot.lane.b32.xlu0 %v425_v41, %s823_s7 }
  0xd5   : > { %417 = vrot.lane.b32.xlu1 %v415_v43, %s823_s7 }
  0xd7   : > { %v313_v44 = vpop.permute.xlu1 %312 }
  0xd8   : > { %v319_v47 = vmul.f32 %v318_v20, %v313_v44 }
  0xdc   : > { %v323_v46 = vpop.permute.xlu1 %322 }
  0xdd   : > { %v329_v48 = vmul.f32 %v328_v27, %v323_v46 }
  0xdf   : > { %v330_v50 = vadd.f32 %v329_v48, %v319_v47 }
  0xe1   : > { %v343_v51 = vpop.permute.xlu1 %342  ;;  %v340_v52 = vadd.f32 %v339_v49, %v330_v50 }
  0xe2   : > { %v349_v53 = vmul.f32 %v348_v32, %v343_v51 }
  0xe4   : > { %v350_v54 = vadd.f32 %v349_v53, %v340_v52 }
 0x12f   : > { %v358_v55 = vpop.permute.xlu1 %357 }
 0x130   : > { %v360_v57 = vadd.f32 %v358_v55, %v350_v54 }
 0x134   : > { %v368_v56 = vpop.permute.xlu0 %367 }
 0x135   : > { %v370_v59 = vadd.f32 %v368_v56, %v360_v57 }
 0x138   : > { %v378_v58 = vpop.permute.xlu1 %377 }
 0x139   : > { %v380_v61 = vadd.f32 %v378_v58, %v370_v59 }
 0x13c   : > { %v398_v60 = vpop.permute.xlu1 %397 }
 0x13d   : > { %v388_v62 = vpop.permute.xlu0 %387 }
 0x13e   : > { %v390_v63 = vadd.f32 %v388_v62, %v380_v61 }
 0x140   : > { %v400_v1 = vadd.f32 %v398_v60, %v390_v63 }
 0x142   : > { %v408_v0 = vpop.permute.xlu1 %407 }
 0x143   : > { %v410_v4 = vadd.f32 %v408_v0, %v400_v1 }
 0x147   : > { %v418_v2 = vpop.permute.xlu1 %417 }
 0x148   : > { %v420_v5 = vadd.f32 %v418_v2, %v410_v4 }
 0x14e   : > { %v435_v3 = vpop.permute.xlu0 %434 }
 0x152   : > { %v428_v6 = vpop.permute.xlu0 %427 }
 0x153   : > { %v430_v7 = vadd.f32 %v428_v6, %v420_v5 }
 0x155   : > { %v437_v8 = vadd.f32 %v435_v3, %v430_v7 }
 0x157   : > { %vm438_vm1 = vcmp.ge.f32.partialorder %v437_v8, 0.0  ;;  %v439_v9 = vmul.f32 0.01, %v437_v8 }
 0x159   : > { %v440_v10 = vsel %vm438_vm1, %v437_v8, %v439_v9 }
 0x15a   : > { %442 = vst.msk [vmem:[%s285_s24] sm:$0xff] %vm441_vm2, %v440_v10 }
 0x15b   : > { %737 = shalt.err (!%p734_p4)
}
 0x15c   : > { %s738_s11 = scalar_lea.hbm %s988_s14, 128  ;;  %s742_s8 = scalar_lea.hbm %s1041_s4, 256 }
 0x15d   : > { %p739_p10 = scmp.ne.s32.totalorder %s988_s14, %s738_s11  ;;  %p743_p2 = scmp.lt.u32.totalorder %s988_s14, %s1041_s4 }
 0x15e   : > { %p744_p5 = scmp.lt.u32.totalorder %s742_s8, %s738_s11  ;;  %p746_p8 = scmp.lt.u32.totalorder %s738_s11, %s988_s14 }
 0x15f   : > { %p740_p12 = pnand %p739_p10, %p1050_p11 }
 0x160   : > { %p745_p9 = por %p744_p5, %p743_p2 }
 0x161   : > { %p741_p1 = pneg %p740_p12 }
 0x162   : > { %p747_p0 = por %p746_p8, %p745_p9 }
 0x164   : > { %p748_p7 = pnand %p747_p0, %p741_p1 }
 0x166   : > { %751 = shalt.err (!%p748_p7)
}
 0x167   : > { %606 = dma.vmem_to_hbm [thread:$0]  (%p1050_p11), %s990_s10, 128, %s988_s14, %s444_s25  }
 0x168 PF: > { %s471_s22 = sand.u32 1, %s786_s15   ;;  %p1051_p13 = scmp.ne.s32.totalorder %s1046_s30, 0 }
 0x169   : > { %p1052_p3 = scmp.ge.s32.totalorder %s806_s20, 2  ;;  %s472_s24 = scalar_lea.sflag [#allocation4], %s471_s22 }
 0x16b   : > { %p613_p6 = pnand %p1052_p3, %p1051_p13 }
 0x16d   : > { %781 = dma.done.wait (!%p613_p6), %s472_s24, 128  }
 0x16e   : > { %783 = vsyncadd (!%p613_p6), %s472_s24, 4294967168  ;;  %s20_s20 = sadd.s32 1, %s806_s20   ;;  %s1053_s15 = smov %s790_s16 }
 0x16f   : > { %p17_p4 = scmp.ge.s32.totalorder %s20_s20, 4   ;;  %s1054_s16 = smov %s794_s17 }
 0x170   : > { %s1055_s17 = smov %s906_s29  ;;  %s1056_s18 = smov %s802_s19 }
 0x171   : > { %s1057_s19 = smov %s1059_s23  ;;  %19 = sbr.rel (!%p17_p4) target bundleno = 6 (0x6), region = 90 }
 0x178   :  { %477 = vsyncpa [#allocation3], 1 }
 0x179   :  { %479 = vsyncpa [#allocation3 + $0x1], 1 }
 0x17a   :  { %480 = vsyncpa [#allocation4], 1 }
 0x17b   :  { %482 = vsyncpa [#allocation4 + $0x1], 1 }

</bundles_post_ra>
